<compile_context>
chip_gen: v5e
topology: v5e:2x2
jax: 0.10.0
libtpu: 0.0.40
codegen_flags: <defaults>
</compile_context>

<pallas_src>
import jax
import jax.numpy as jnp
from jax.experimental import pallas as pl
from jax.experimental.pallas import tpu as pltpu

# ---- Config (matches ConstraintCritic.Config defaults, small hidden_dim) ----
TRUNK_LAYERS = 2
HEAD_LAYERS = 1
HIDDEN_DIM = 32          # small for the demo (module default would be 256)
LOG_STD_MIN = -4.0
LOG_STD_MAX = 4.0
STD_RATIO = 2.0


def _softplus(x):
    # numerically-stable softplus (VPU + EUP ops)
    return jnp.maximum(x, 0.0) + jnp.log1p(jnp.exp(-jnp.abs(x)))


# ------------------------------- kernels ----------------------------------- #

def _trunk(state, action, w0s_ref, w0a_ref, b0_ref, w1_ref, b1_ref):
    # h = relu([state|action] @ w0 + b0)  without materializing the concat
    h = jnp.dot(state, w0s_ref[...], preferred_element_type=jnp.float32)
    h = h + jnp.dot(action, w0a_ref[...], preferred_element_type=jnp.float32)
    h = jnp.maximum(h + b0_ref[...], 0.0)
    h = jnp.dot(h, w1_ref[...], preferred_element_type=jnp.float32) + b1_ref[...]
    return jnp.maximum(h, 0.0)


def _mean_kernel(state_ref, action_ref,
                 w0s_ref, w0a_ref, b0_ref, w1_ref, b1_ref,
                 wm0_ref, bm0_ref, wm1_ref, bm1_ref,
                 mean_ref):
    h = _trunk(state_ref[...], action_ref[...],
               w0s_ref, w0a_ref, b0_ref, w1_ref, b1_ref)
    hm = jnp.maximum(
        jnp.dot(h, wm0_ref[...], preferred_element_type=jnp.float32) + bm0_ref[...],
        0.0)
    mean_ref[...] = (jnp.dot(hm, wm1_ref[...], preferred_element_type=jnp.float32)
                     + bm1_ref[...])


def _mean_std(state_ref, action_ref,
              w0s_ref, w0a_ref, b0_ref, w1_ref, b1_ref,
              wh0_ref, bh0_ref, wh1_ref, bh1_ref):
    h = _trunk(state_ref[...], action_ref[...],
               w0s_ref, w0a_ref, b0_ref, w1_ref, b1_ref)
    # fused first head layer: [H, 2H]  (mean half | log_std half)
    hh = jnp.maximum(
        jnp.dot(h, wh0_ref[...], preferred_element_type=jnp.float32) + bh0_ref[...],
        0.0)
    # block-diagonal second head layer: [2H, 2] -> col 0 = mean, col 1 = log_std
    ms = (jnp.dot(hh, wh1_ref[...], preferred_element_type=jnp.float32)
          + bh1_ref[...])
    mean = ms[:, 0:1]
    log_std = ms[:, 1:2]
    log_std = LOG_STD_MAX - _softplus(LOG_STD_MAX - log_std)
    log_std = LOG_STD_MIN + _softplus(log_std - LOG_STD_MIN)
    std = jnp.exp(log_std)
    return mean, std


def _uncertainty_kernel(state_ref, action_ref,
                        w0s_ref, w0a_ref, b0_ref, w1_ref, b1_ref,
                        wh0_ref, bh0_ref, wh1_ref, bh1_ref,
                        qc_ref):
    mean, std = _mean_std(state_ref, action_ref,
                          w0s_ref, w0a_ref, b0_ref, w1_ref, b1_ref,
                          wh0_ref, bh0_ref, wh1_ref, bh1_ref)
    qc_ref[...] = mean + STD_RATIO * std       # fused post-op (free VPU filler)


def _sample_kernel(state_ref, action_ref,
                   w0s_ref, w0a_ref, b0_ref, w1_ref, b1_ref,
                   wh0_ref, bh0_ref, wh1_ref, bh1_ref,
                   mean_ref, std_ref):
    mean, std = _mean_std(state_ref, action_ref,
                          w0s_ref, w0a_ref, b0_ref, w1_ref, b1_ref,
                          wh0_ref, bh0_ref, wh1_ref, bh1_ref)
    mean_ref[...] = mean
    std_ref[...] = std


# ---------------------------- params / wrapper ------------------------------ #

def init_params(key, state_dim, action_dim, output_dim, hidden_dim=HIDDEN_DIM):
    """PyTorch-Linear-style init: U(-1/sqrt(fan_in), 1/sqrt(fan_in)). Weights [in,out]."""
    in_dim = state_dim + action_dim
    trunk_dims = [in_dim] + [hidden_dim] * TRUNK_LAYERS
    head_dims = [hidden_dim] * (HEAD_LAYERS + 1) + [output_dim]

    def linear(key, fan_in, fan_out):
        kw, kb = jax.random.split(key)
        bound = 1.0 / jnp.sqrt(fan_in)
        w = jax.random.uniform(kw, (fan_in, fan_out), jnp.float32, -bound, bound)
        b = jax.random.uniform(kb, (1, fan_out), jnp.float32, -bound, bound)
        return w, b

    params = []
    keys = jax.random.split(key, 6)
    for li in range(TRUNK_LAYERS):
        params.extend(linear(keys[li], trunk_dims[li], trunk_dims[li + 1]))
    for li in range(HEAD_LAYERS + 1):
        params.extend(linear(keys[2 + li], head_dims[li], head_dims[li + 1]))
    for li in range(HEAD_LAYERS + 1):
        params.extend(linear(keys[4 + li], head_dims[li], head_dims[li + 1]))
    return tuple(params)


def prepare_params(params, state_dim):
    """One-time weight re-layout: split w0, fuse the two heads."""
    (w0, b0, w1, b1, wm0, bm0, wm1, bm1, wl0, bl0, wl1, bl1) = params
    assert wm1.shape[1] == 1, "squeeze_output head implies output_dim == 1"
    hidden = wm0.shape[0]
    w0s = w0[:state_dim]                                 # [state_dim, H]
    w0a = w0[state_dim:]                                 # [action_dim, H]
    wh0 = jnp.concatenate([wm0, wl0], axis=1)            # [H, 2H]
    bh0 = jnp.concatenate([bm0, bl0], axis=1)            # [1, 2H]
    wh1 = jnp.zeros((2 * hidden, 2), jnp.float32)        # block-diag [2H, 2]
    wh1 = wh1.at[:hidden, 0:1].set(wm1)
    wh1 = wh1.at[hidden:, 1:2].set(wl1)
    bh1 = jnp.concatenate([bm1, bl1], axis=1)            # [1, 2]
    return dict(
        trunk=(w0s, w0a, b0, w1, b1),
        mean_head=(wm0, bm0, wm1, bm1),
        fused_heads=(wh0, bh0, wh1, bh1),
    )


def _round_up(x, m):
    return ((x + m - 1) // m) * m


def _batch_tiling(batch, batch_tile):
    """Pick (padded_batch, tile). tile==padded_batch when one step suffices."""
    if batch <= batch_tile:
        return batch, batch                 # grid = (1,), block == full array
    tile = _round_up(max(8, min(batch_tile, batch)), 8)
    return _round_up(batch, tile), tile


def constraint_critic_forward(state, action, prepared, *,
                              uncertainty=False, sample=False,
                              noise_key=None, batch_tile=512):
    """JAX/Pallas equivalent of ConstraintCritic.forward."""
    assert not (uncertainty and sample), \
        "Uncertainty bound and sample cannot be True simultaneously."

    state = state.astype(jnp.float32)
    action = action.astype(jnp.float32)
    batch = state.shape[0]
    padded, tb = _batch_tiling(batch, batch_tile)
    if padded != batch:
        pad = padded - batch
        state = jnp.pad(state, ((0, pad), (0, 0)))
        action = jnp.pad(action, ((0, pad), (0, 0)))
    state_dim = state.shape[1]
    action_dim = action.shape[1]

    trunk = prepared["trunk"]
    row_spec = pl.BlockSpec((tb, 1), lambda i: (i, 0))

    if not uncertainty and not sample:
        kernel = _mean_kernel
        weights = trunk + prepared["mean_head"]
        out_shape = jax.ShapeDtypeStruct((padded, 1), jnp.float32)
        out_specs = row_spec
    elif uncertainty:
        kernel = _uncertainty_kernel
        weights = trunk + prepared["fused_heads"]
        out_shape = jax.ShapeDtypeStruct((padded, 1), jnp.float32)
        out_specs = row_spec
    else:  # sample
        kernel = _sample_kernel
        weights = trunk + prepared["fused_heads"]
        out_shape = (jax.ShapeDtypeStruct((padded, 1), jnp.float32),
                     jax.ShapeDtypeStruct((padded, 1), jnp.float32))
        out_specs = (pl.BlockSpec((tb, 1), lambda i: (i, 0)),
                     pl.BlockSpec((tb, 1), lambda i: (i, 0)))

    in_specs = [pl.BlockSpec((tb, state_dim), lambda i: (i, 0)),
                pl.BlockSpec((tb, action_dim), lambda i: (i, 0))]
    in_specs += [pl.BlockSpec(w.shape, lambda i: (0, 0)) for w in weights]

    result = pl.pallas_call(
        kernel,
        out_shape=out_shape,
        grid_spec=pltpu.PrefetchScalarGridSpec(
            num_scalar_prefetch=0,
            grid=(padded // tb,),
            in_specs=in_specs,
            out_specs=out_specs,
        ),
        compiler_params=pltpu.CompilerParams(
            dimension_semantics=("parallel",)),
    )(state, action, *weights)

    if not uncertainty and not sample:
        return result[:batch, 0]
    if uncertainty:
        return result[:batch, 0]
    mean = result[0][:batch, 0]
    std = result[1][:batch, 0]
    # TODO(synk): the clipped Gaussian noise could be generated in-kernel with
    # pltpu.prng_seed / stateful PRNG; kept outside to preserve jax.random keys.
    noise = jnp.clip(jax.random.normal(noise_key, std.shape, std.dtype), -2.0, 2.0)
    return mean, std, mean + noise * std


# ------------------------------ reference ----------------------------------- #

def _reference_mean_std(state, action, params):
    (w0, b0, w1, b1, wm0, bm0, wm1, bm1, wl0, bl0, wl1, bl1) = params
    x = jnp.concatenate([state, action], axis=-1).astype(jnp.float32)
    h = jnp.maximum(x @ w0 + b0, 0.0)
    h = jnp.maximum(h @ w1 + b1, 0.0)
    hm = jnp.maximum(h @ wm0 + bm0, 0.0)
    mean = (hm @ wm1 + bm1)[:, 0]
    hl = jnp.maximum(h @ wl0 + bl0, 0.0)
    ls = (hl @ wl1 + bl1)[:, 0]
    ls = LOG_STD_MAX - _softplus(LOG_STD_MAX - ls)
    ls = LOG_STD_MIN + _softplus(ls - LOG_STD_MIN)
    return mean, jnp.exp(ls)


if __name__ == "__main__":
    key = jax.random.PRNGKey(0)
    k_params, k_state, k_action, k_noise = jax.random.split(key, 4)

    STATE_DIM, ACTION_DIM, OUTPUT_DIM = 12, 4, 1
    BATCH = 64

    params = init_params(k_params, STATE_DIM, ACTION_DIM, OUTPUT_DIM)
    prepared = prepare_params(params, STATE_DIM)
    state = jax.random.normal(k_state, (BATCH, STATE_DIM), jnp.float32)
    action = jax.random.normal(k_action, (BATCH, ACTION_DIM), jnp.float32)

    # default path (mean only, log_std head skipped entirely), grid = (1,)
    mean = constraint_critic_forward(state, action, prepared)
    jax.block_until_ready(mean)

    # uncertainty path: fused heads, mean + std_ratio*std computed in-kernel
    qc_upper = constraint_critic_forward(state, action, prepared, uncertainty=True)
    jax.block_until_ready(qc_upper)

    # sample path: (mean, std, mean + clipped_noise * std)
    s_mean, s_std, s_qc = constraint_critic_forward(
        state, action, prepared, sample=True, noise_key=k_noise)
    jax.block_until_ready(s_qc)

    # exercise the multi-step "parallel" batch axis (tb=16 -> grid of 4 steps)
    mean_tiled = constraint_critic_forward(state, action, prepared, batch_tile=16)
    jax.block_until_ready(mean_tiled)

    # correctness checks against a pure-JAX reference
    ref_mean, ref_std = _reference_mean_std(state, action, params)
    assert jnp.allclose(mean, ref_mean, atol=1e-4, rtol=1e-4)
    assert jnp.allclose(mean_tiled, ref_mean, atol=1e-4, rtol=1e-4)
    assert jnp.allclose(qc_upper, ref_mean + STD_RATIO * ref_std, atol=1e-4, rtol=1e-4)
    assert jnp.allclose(s_mean, ref_mean, atol=1e-4, rtol=1e-4)
    assert jnp.allclose(s_std, ref_std, atol=1e-4, rtol=1e-4)

    print("KERNEL_OK")
</pallas_src>

<mosaic_0001>
module attributes {stable_mosaic.version = 11 : i64} {
  func.func @_mean_kernel(%arg0: i32, %arg1: memref<64x12xf32, #tpu.memory_space<vmem>>, %arg2: memref<64x4xf32, #tpu.memory_space<vmem>>, %arg3: memref<12x32xf32, #tpu.memory_space<vmem>>, %arg4: memref<4x32xf32, #tpu.memory_space<vmem>>, %arg5: memref<1x32xf32, #tpu.memory_space<vmem>>, %arg6: memref<32x32xf32, #tpu.memory_space<vmem>>, %arg7: memref<1x32xf32, #tpu.memory_space<vmem>>, %arg8: memref<32x32xf32, #tpu.memory_space<vmem>>, %arg9: memref<1x32xf32, #tpu.memory_space<vmem>>, %arg10: memref<32x1xf32, #tpu.memory_space<vmem>>, %arg11: memref<1x1xf32, #tpu.memory_space<vmem>>, %arg12: memref<64x1xf32, #tpu.memory_space<vmem>>) attributes {dimension_semantics = [#tpu.dimension_semantics<parallel>], iteration_bounds = array<i64: 1>, scalar_prefetch = 0 : i64, scratch_operands = 0 : i64, tpu.core_type = #tpu.core_type<tc>, window_params = [{transform_indices = @transform_0, window_bounds = array<i64: 64, 12>}, {transform_indices = @transform_1, window_bounds = array<i64: 64, 4>}, {pipeline_mode = #tpu.pipeline_mode<synchronous>, transform_indices = @transform_2, window_bounds = array<i64: 12, 32>}, {pipeline_mode = #tpu.pipeline_mode<synchronous>, transform_indices = @transform_3, window_bounds = array<i64: 4, 32>}, {pipeline_mode = #tpu.pipeline_mode<synchronous>, transform_indices = @transform_4, window_bounds = array<i64: 1, 32>}, {pipeline_mode = #tpu.pipeline_mode<synchronous>, transform_indices = @transform_5, window_bounds = array<i64: 32, 32>}, {pipeline_mode = #tpu.pipeline_mode<synchronous>, transform_indices = @transform_6, window_bounds = array<i64: 1, 32>}, {pipeline_mode = #tpu.pipeline_mode<synchronous>, transform_indices = @transform_7, window_bounds = array<i64: 32, 32>}, {pipeline_mode = #tpu.pipeline_mode<synchronous>, transform_indices = @transform_8, window_bounds = array<i64: 1, 32>}, {pipeline_mode = #tpu.pipeline_mode<synchronous>, transform_indices = @transform_9, window_bounds = array<i64: 32, 1>}, {pipeline_mode = #tpu.pipeline_mode<synchronous>, transform_indices = @transform_10, window_bounds = array<i64: 1, 1>}, {transform_indices = @transform_11, window_bounds = array<i64: 64, 1>}]} {
    %c0 = arith.constant 0 : index
    %c0_0 = arith.constant 0 : index
    %0 = vector.load %arg1[%c0, %c0_0] : memref<64x12xf32, #tpu.memory_space<vmem>>, vector<64x12xf32>
    %c0_1 = arith.constant 0 : index
    %c0_2 = arith.constant 0 : index
    %1 = vector.load %arg2[%c0_1, %c0_2] : memref<64x4xf32, #tpu.memory_space<vmem>>, vector<64x4xf32>
    %c0_3 = arith.constant 0 : index
    %c0_4 = arith.constant 0 : index
    %2 = vector.load %arg3[%c0_3, %c0_4] : memref<12x32xf32, #tpu.memory_space<vmem>>, vector<12x32xf32>
    %cst = arith.constant dense<0.000000e+00> : vector<64x32xf32>
    %3 = tpu.matmul %0, %2, %cst {dimension_numbers = #tpu.dot_dimension_numbers<[1], [0], [0], [1], [0, 0, 1, 1], [], []>} : vector<64x12xf32>, vector<12x32xf32>, vector<64x32xf32> -> vector<64x32xf32>
    %c0_5 = arith.constant 0 : index
    %c0_6 = arith.constant 0 : index
    %4 = vector.load %arg4[%c0_5, %c0_6] : memref<4x32xf32, #tpu.memory_space<vmem>>, vector<4x32xf32>
    %cst_7 = arith.constant dense<0.000000e+00> : vector<64x32xf32>
    %5 = tpu.matmul %1, %4, %cst_7 {dimension_numbers = #tpu.dot_dimension_numbers<[1], [0], [0], [1], [0, 0, 1, 1], [], []>} : vector<64x4xf32>, vector<4x32xf32>, vector<64x32xf32> -> vector<64x32xf32>
    %6 = arith.addf %3, %5 : vector<64x32xf32>
    %c0_8 = arith.constant 0 : index
    %c0_9 = arith.constant 0 : index
    %7 = vector.load %arg5[%c0_8, %c0_9] : memref<1x32xf32, #tpu.memory_space<vmem>>, vector<1x32xf32>
    %8 = vector.broadcast %7 : vector<1x32xf32> to vector<64x32xf32>
    %9 = arith.addf %6, %8 : vector<64x32xf32>
    %cst_10 = arith.constant 0.000000e+00 : f32
    %10 = vector.broadcast %cst_10 : f32 to vector<64x32xf32>
    %11 = arith.maximumf %9, %10 : vector<64x32xf32>
    %c0_11 = arith.constant 0 : index
    %c0_12 = arith.constant 0 : index
    %12 = vector.load %arg6[%c0_11, %c0_12] : memref<32x32xf32, #tpu.memory_space<vmem>>, vector<32x32xf32>
    %cst_13 = arith.constant dense<0.000000e+00> : vector<64x32xf32>
    %13 = tpu.matmul %11, %12, %cst_13 {dimension_numbers = #tpu.dot_dimension_numbers<[1], [0], [0], [1], [0, 0, 1, 1], [], []>} : vector<64x32xf32>, vector<32x32xf32>, vector<64x32xf32> -> vector<64x32xf32>
    %c0_14 = arith.constant 0 : index
    %c0_15 = arith.constant 0 : index
    %14 = vector.load %arg7[%c0_14, %c0_15] : memref<1x32xf32, #tpu.memory_space<vmem>>, vector<1x32xf32>
    %15 = vector.broadcast %14 : vector<1x32xf32> to vector<64x32xf32>
    %16 = arith.addf %13, %15 : vector<64x32xf32>
    %cst_16 = arith.constant 0.000000e+00 : f32
    %17 = vector.broadcast %cst_16 : f32 to vector<64x32xf32>
    %18 = arith.maximumf %16, %17 : vector<64x32xf32>
    %c0_17 = arith.constant 0 : index
    %c0_18 = arith.constant 0 : index
    %19 = vector.load %arg8[%c0_17, %c0_18] : memref<32x32xf32, #tpu.memory_space<vmem>>, vector<32x32xf32>
    %cst_19 = arith.constant dense<0.000000e+00> : vector<64x32xf32>
    %20 = tpu.matmul %18, %19, %cst_19 {dimension_numbers = #tpu.dot_dimension_numbers<[1], [0], [0], [1], [0, 0, 1, 1], [], []>} : vector<64x32xf32>, vector<32x32xf32>, vector<64x32xf32> -> vector<64x32xf32>
    %c0_20 = arith.constant 0 : index
    %c0_21 = arith.constant 0 : index
    %21 = vector.load %arg9[%c0_20, %c0_21] : memref<1x32xf32, #tpu.memory_space<vmem>>, vector<1x32xf32>
    %22 = vector.broadcast %21 : vector<1x32xf32> to vector<64x32xf32>
    %23 = arith.addf %20, %22 : vector<64x32xf32>
    %cst_22 = arith.constant 0.000000e+00 : f32
    %24 = vector.broadcast %cst_22 : f32 to vector<64x32xf32>
    %25 = arith.maximumf %23, %24 : vector<64x32xf32>
    %c0_23 = arith.constant 0 : index
    %c0_24 = arith.constant 0 : index
    %26 = vector.load %arg10[%c0_23, %c0_24] : memref<32x1xf32, #tpu.memory_space<vmem>>, vector<32x1xf32>
    %cst_25 = arith.constant dense<0.000000e+00> : vector<64x1xf32>
    %27 = tpu.matmul %25, %26, %cst_25 {dimension_numbers = #tpu.dot_dimension_numbers<[1], [0], [0], [1], [0, 0, 1, 1], [], []>} : vector<64x32xf32>, vector<32x1xf32>, vector<64x1xf32> -> vector<64x1xf32>
    %c0_26 = arith.constant 0 : index
    %c0_27 = arith.constant 0 : index
    %28 = vector.load %arg11[%c0_26, %c0_27] : memref<1x1xf32, #tpu.memory_space<vmem>>, vector<1x1xf32>
    %29 = vector.broadcast %28 : vector<1x1xf32> to vector<64x1xf32>
    %30 = arith.addf %27, %29 : vector<64x1xf32>
    %c0_28 = arith.constant 0 : index
    %c0_29 = arith.constant 0 : index
    %31 = vector.load %arg12[%c0_28, %c0_29] : memref<64x1xf32, #tpu.memory_space<vmem>>, vector<64x1xf32>
    tpu.vector_store %arg12[%c0_28, %c0_29], %30 {strides = array<i32>} : memref<64x1xf32, #tpu.memory_space<vmem>>, vector<64x1xf32>,
    return
  }
  func.func @transform_0(%arg0: i32) -> (i32, i32) {
    %c0_i32 = arith.constant 0 : i32
    %c0_i32_0 = arith.constant 0 : i32
    return %arg0, %c0_i32 : i32, i32
  }
  func.func @transform_1(%arg0: i32) -> (i32, i32) {
    %c0_i32 = arith.constant 0 : i32
    %c0_i32_0 = arith.constant 0 : i32
    return %arg0, %c0_i32 : i32, i32
  }
  func.func @transform_2(%arg0: i32) -> (i32, i32) {
    %c0_i32 = arith.constant 0 : i32
    %c0_i32_0 = arith.constant 0 : i32
    %c0_i32_1 = arith.constant 0 : i32
    return %c0_i32, %c0_i32_0 : i32, i32
  }
  func.func @transform_3(%arg0: i32) -> (i32, i32) {
    %c0_i32 = arith.constant 0 : i32
    %c0_i32_0 = arith.constant 0 : i32
    %c0_i32_1 = arith.constant 0 : i32
    return %c0_i32, %c0_i32_0 : i32, i32
  }
  func.func @transform_4(%arg0: i32) -> (i32, i32) {
    %c0_i32 = arith.constant 0 : i32
    %c0_i32_0 = arith.constant 0 : i32
    %c0_i32_1 = arith.constant 0 : i32
    return %c0_i32, %c0_i32_0 : i32, i32
  }
  func.func @transform_5(%arg0: i32) -> (i32, i32) {
    %c0_i32 = arith.constant 0 : i32
    %c0_i32_0 = arith.constant 0 : i32
    %c0_i32_1 = arith.constant 0 : i32
    return %c0_i32, %c0_i32_0 : i32, i32
  }
  func.func @transform_6(%arg0: i32) -> (i32, i32) {
    %c0_i32 = arith.constant 0 : i32
    %c0_i32_0 = arith.constant 0 : i32
    %c0_i32_1 = arith.constant 0 : i32
    return %c0_i32, %c0_i32_0 : i32, i32
  }
  func.func @transform_7(%arg0: i32) -> (i32, i32) {
    %c0_i32 = arith.constant 0 : i32
    %c0_i32_0 = arith.constant 0 : i32
    %c0_i32_1 = arith.constant 0 : i32
    return %c0_i32, %c0_i32_0 : i32, i32
  }
  func.func @transform_8(%arg0: i32) -> (i32, i32) {
    %c0_i32 = arith.constant 0 : i32
    %c0_i32_0 = arith.constant 0 : i32
    %c0_i32_1 = arith.constant 0 : i32
    return %c0_i32, %c0_i32_0 : i32, i32
  }
  func.func @transform_9(%arg0: i32) -> (i32, i32) {
    %c0_i32 = arith.constant 0 : i32
    %c0_i32_0 = arith.constant 0 : i32
    %c0_i32_1 = arith.constant 0 : i32
    return %c0_i32, %c0_i32_0 : i32, i32
  }
  func.func @transform_10(%arg0: i32) -> (i32, i32) {
    %c0_i32 = arith.constant 0 : i32
    %c0_i32_0 = arith.constant 0 : i32
    %c0_i32_1 = arith.constant 0 : i32
    return %c0_i32, %c0_i32_0 : i32, i32
  }
  func.func @transform_11(%arg0: i32) -> (i32, i32) {
    %c0_i32 = arith.constant 0 : i32
    %c0_i32_0 = arith.constant 0 : i32
    return %arg0, %c0_i32 : i32, i32
  }
}

</mosaic_0001>

<bundles_post_ra>
// kernel: tpu_custom_call.1
= control target key start
LH: loop header
LB: loop body
LE: loop exit
PB: predicated region body
PF: predicated region fallthrough
CT: control target
= control target key end

     0   :  { %vm84_vm0 = vcmask 1043456   ;;  %vm59_vm1 = vcmask 31744   ;;  %vm129_vm2 = vcmask 97280   ;;  %vm226_vm3 = vcmask 261120   ;;  %s753_s3 = inlined_call_operand.vmem [shape: f32[4,32], index: 3, kind: input, shape index: {}]   ;;  %s754_s1 = inlined_call_operand.vmem [shape: f32[64,4], index: 1, kind: input, shape index: {}]   ;;  %s755_s2 = inlined_call_operand.vmem [shape: f32[12,32], index: 2, kind: input, shape index: {}]   ;;  %s756_s4 = inlined_call_operand.vmem [shape: f32[1,32], index: 4, kind: input, shape index: {}]   ;;  %s757_s0 = inlined_call_operand.vmem [shape: f32[64,12], index: 0, kind: input, shape index: {}]   ;;  %s758_s6 = inlined_call_operand.vmem [shape: f32[1,32], index: 6, kind: input, shape index: {}]   ;;  %s759_s5 = inlined_call_operand.vmem [shape: f32[32,32], index: 5, kind: input, shape index: {}]   ;;  %s760_s7 = inlined_call_operand.vmem [shape: f32[32,32], index: 7, kind: input, shape index: {}]   ;;  %s761_s8 = inlined_call_operand.vmem [shape: f32[1,32], index: 8, kind: input, shape index: {}]   ;;  %s762_s9 = inlined_call_operand.vmem [shape: f32[32,1], index: 9, kind: input, shape index: {}]   ;;  %s763_s10 = inlined_call_operand.<no memory space> [shape: f32[1,1], index: 10, kind: input, shape index: {}]   ;;  %s764_s11 = inlined_call_operand.vmem [shape: f32[64,1], index: 11, kind: output, shape index: {}]  }
   0x1   :  { %v58_v0 = vld [vmem:[%s753_s3] sm:$0xf]  ;;  %v50_v1 = vld [vmem:[%s754_s1 + $0x10] sm:$0xff]  ;;  %v57_v2 = vld [vmem:[%s755_s2 + $0x8] sm:$0xf]  ;;  %vm454_vm4 = vcmask 7168  }
   0x2   :  { %509 = vmatpush.msk.msra.mxu1 %vm84_vm0, %v58_v0  ;;  %467 = vmatpush.msk.msra.mxu0 %vm84_vm0, %v58_v0  ;;  %v48_v3 = vld [vmem:[%s754_s1] sm:$0xff]  ;;  %v51_v5 = vld [vmem:[%s754_s1 + $0x18] sm:$0xff]  ;;  %v49_v6 = vld [vmem:[%s754_s1 + $0x8] sm:$0xff] }
   0x3   :  { %470 = vmatmul.msk.f32.vlgmr.msra.gmra.mxu1 %vm59_vm1, %v50_v1  ;;  %v56_v4 = vld [vmem:[%s755_s2] sm:$0xff]  ;;  %468 = vmatmul.msk.f32.vlgmr.msra.gmra.mxu0 %vm59_vm1, %v48_v3  ;;  %v53_v9 = vld [vmem:[%s754_s1 + $0x28] sm:$0xff]  ;;  %v54_v11 = vld [vmem:[%s754_s1 + $0x30] sm:$0xff] }
   0x4   :  { %476 = vmatpush.msk.msrb.mxu1 %vm84_vm0, %v57_v2  ;;  %510 = vmatpush.msk.msra.mxu2 %vm84_vm0, %v58_v0  ;;  %v52_v7 = vld [vmem:[%s754_s1 + $0x20] sm:$0xff]  ;;  %v41_v10 = vld [vmem:[%s757_s0 + $0x8] sm:$0xff]  ;;  %v42_v12 = vld [vmem:[%s757_s0 + $0x10] sm:$0xff] }
   0x5   :  { %511 = vmatpush.msk.msra.mxu3 %vm84_vm0, %v58_v0  ;;  %472 = vmatmul.msk.f32.vlgmr.msra.gmra.mxu2 %vm59_vm1, %v52_v7  ;;  %v40_v8 = vld [vmem:[%s757_s0] sm:$0xff]  ;;  %v55_v13 = vld [vmem:[%s754_s1 + $0x38] sm:$0xff]  ;;  %v45_v16 = vld [vmem:[%s757_s0 + $0x28] sm:$0xff] }
   0x6   :  { %172 = vmatpush.msrb.mxu1 %v56_v4  ;;  %474 = vmatmul.msk.f32.vlgmr.msra.gmra.mxu3 %vm59_vm1, %v54_v11  ;;  %v43_v14 = vld [vmem:[%s757_s0 + $0x18] sm:$0xff]  ;;  %v44_v15 = vld [vmem:[%s757_s0 + $0x20] sm:$0xff]  ;;  %v46_v17 = vld [vmem:[%s757_s0 + $0x30] sm:$0xff] }
   0x7   :  { %v47_v18 = vld [vmem:[%s757_s0 + $0x38] sm:$0xff]  ;;  %v220_v20 = vld [vmem:[%s759_s5 + $0x10] sm:$0xff]  ;;  %v219_v21 = vld [vmem:[%s759_s5 + $0x8] sm:$0xff] }
   0x8   :  { %v221_v19 = vld [vmem:[%s759_s5 + $0x18] sm:$0xff]  ;;  %v218_v22 = vld [vmem:[%s759_s5] sm:$0xff]  ;;  %v302_v46 = vld [vmem:[%s760_s7 + $0x10] sm:$0xff] }
   0x9   :  { %263 = vmatpush.msrb.mxu2 %v221_v19  ;;  %v512_v26 = vld [vmem:[%s756_s4] ss:$0 sm:$0xff]  ;;  %v303_v45 = vld [vmem:[%s760_s7 + $0x18] sm:$0xff]  ;;  %v301_v49 = vld [vmem:[%s760_s7 + $0x8] sm:$0xff] }
   0xa   :  { %344 = vmatpush.msrb.mxu3 %v303_v45  ;;  %v300_v3 = vld [vmem:[%s760_s7] sm:$0xff]  ;;  %v382_v19 = vld [vmem:[%s762_s9 + $0x8] sm:$0xff] }
   0xb   :  { %471 = vmatmul.msk.f32.gmra.mxu1 %vm59_vm1, %v51_v5  ;;  %469 = vmatmul.msk.f32.gmra.mxu0 %vm59_vm1, %v49_v6  ;;  %v513_v4 = vld [vmem:[%s758_s6] ss:$0 sm:$0xff] }
   0xc   :  { %264 = vmatpush.msrb.mxu2 %v220_v20  ;;  %345 = vmatpush.msrb.mxu3 %v302_v46  ;;  %v16_v46 = vstv %s763_s10 }
   0xd   :  { %473 = vmatmul.msk.f32.gmra.mxu2 %vm59_vm1, %v53_v9  ;;  %17 = vst [vmem:[#allocation2] sm:$0x1] %v16_v46 }
   0xe   :  { %475 = vmatmul.msk.f32.gmra.mxu3 %vm59_vm1, %v55_v13  ;;  %265 = vmatpush.msrb.mxu2 %v219_v21 }
   0xf   :  { %346 = vmatpush.msrb.mxu3 %v301_v49 }
  0x10   :  { %266 = vmatpush.msrb.mxu2 %v218_v22 }
  0x11   :  { %347 = vmatpush.msrb.mxu3 %v300_v3 }
  0x13   :  { %477 = vmatmul.msk.f32.vlgmr.msrb.gmra.mxu1 %vm129_vm2, %v40_v8 }
  0x1b   :  { %478 = vmatmul.msk.f32.gmra.mxu1 %vm129_vm2, %v41_v10 }
  0x23   :  { %479 = vmatmul.msk.f32.gmra.mxu1 %vm129_vm2, %v42_v12 }
  0x2b   :  { %480 = vmatmul.msk.f32.gmra.mxu1 %vm129_vm2, %v43_v14 }
  0x33   :  { %481 = vmatmul.msk.f32.gmra.mxu1 %vm129_vm2, %v44_v15 }
  0x3b   :  { %482 = vmatmul.msk.f32.gmra.mxu1 %vm129_vm2, %v45_v16 }
  0x43   :  { %483 = vmatmul.msk.f32.gmra.mxu1 %vm129_vm2, %v46_v17  ;;  %v384_v17 = vld [vmem:[%s762_s9 + $0x18] sm:$0xff] }
  0x44   :  { %425 = vmatpush.msrb.mxu0 %v384_v17 }
  0x4b   :  { %484 = vmatmul.msk.f32.gmra.mxu1 %vm129_vm2, %v47_v18  ;;  %v383_v18 = vld [vmem:[%s762_s9 + $0x10] sm:$0xff] }
  0x4c   :  { %426 = vmatpush.msrb.mxu0 %v383_v18 }
  0x4e   :  { %427 = vmatpush.msrb.mxu0 %v382_v19 }
  0x80   :  { %v111_v23 = vpop.f32.mrf.mxu1  ;;  %v105_v25 = vpop.f32.mrf.mxu0 }
  0x88   :  { %v114_v24 = vpop.f32.mrf.mxu1  ;;  %v108_v31 = vpop.f32.mrf.mxu0 }
  0x89   :  { %v117_v43 = vpop.f32.mrf.mxu2  ;;  %v123_v56 = vpop.f32.mrf.mxu3 }
  0x90   :  { %v174_v27 = vpop.f32.mrf.mxu1 }
  0x91   :  { %v175_v28 = vadd.f32 %v174_v27, %v105_v25  ;;  %v120_v52 = vpop.f32.mrf.mxu2  ;;  %v126_v62 = vpop.f32.mrf.mxu3 }
  0x93   :  { %v202_v29 = vadd.f32 %v512_v26, %v175_v28 }
  0x95   :  { %v210_v30 = vmax.f32 %v202_v29, 0.0 }
  0x97   :  { %485 = vmatmul.msk.f32.vlgmr.msrb.gmra.mxu2 %vm226_vm3, %v210_v30 }
  0x98   :  { %v177_v32 = vpop.f32.mrf.mxu1 }
  0x99   :  { %v178_v33 = vadd.f32 %v177_v32, %v108_v31  ;;  %v381_v32 = vld [vmem:[%s762_s9] sm:$0xff] }
  0x9a   :  { %428 = vmatpush.msrb.mxu0 %v381_v32 }
  0x9b   :  { %v203_v34 = vadd.f32 %v512_v26, %v178_v33  ;;  %v514_v33 = vld [vmem:[%s761_s8] ss:$0 sm:$0xff] }
  0x9d   :  { %v211_v35 = vmax.f32 %v203_v34, 0.0 }
  0x9f   :  { %486 = vmatmul.msk.f32.gmra.mxu2 %vm226_vm3, %v211_v35 }
  0xa0   :  { %v180_v36 = vpop.f32.mrf.mxu1 }
  0xa1   :  { %v181_v37 = vadd.f32 %v180_v36, %v111_v23 }
  0xa3   :  { %v204_v38 = vadd.f32 %v512_v26, %v181_v37 }
  0xa5   :  { %v212_v39 = vmax.f32 %v204_v38, 0.0 }
  0xa7   :  { %487 = vmatmul.msk.f32.gmra.mxu2 %vm226_vm3, %v212_v39 }
  0xa8   :  { %v183_v40 = vpop.f32.mrf.mxu1 }
  0xa9   :  { %v184_v41 = vadd.f32 %v183_v40, %v114_v24 }
  0xab   :  { %v205_v42 = vadd.f32 %v512_v26, %v184_v41 }
  0xad   :  { %v213_v44 = vmax.f32 %v205_v42, 0.0 }
  0xaf   :  { %488 = vmatmul.msk.f32.gmra.mxu2 %vm226_vm3, %v213_v44 }
  0xb0   :  { %v186_v47 = vpop.f32.mrf.mxu1 }
  0xb1   :  { %v187_v48 = vadd.f32 %v186_v47, %v117_v43 }
  0xb3   :  { %v206_v50 = vadd.f32 %v512_v26, %v187_v48 }
  0xb5   :  { %v214_v51 = vmax.f32 %v206_v50, 0.0 }
  0xb7   :  { %489 = vmatmul.msk.f32.gmra.mxu2 %vm226_vm3, %v214_v51 }
  0xb8   :  { %v189_v53 = vpop.f32.mrf.mxu1 }
  0xb9   :  { %v190_v54 = vadd.f32 %v189_v53, %v120_v52 }
  0xbb   :  { %v207_v55 = vadd.f32 %v512_v26, %v190_v54 }
  0xbd   :  { %v215_v57 = vmax.f32 %v207_v55, 0.0 }
  0xbf   :  { %490 = vmatmul.msk.f32.gmra.mxu2 %vm226_vm3, %v215_v57 }
  0xc0   :  { %v192_v58 = vpop.f32.mrf.mxu1 }
  0xc1   :  { %v193_v59 = vadd.f32 %v192_v58, %v123_v56 }
  0xc3   :  { %v208_v60 = vadd.f32 %v512_v26, %v193_v59  ;;  %v515_v59 = vld [vmem:[#allocation2] ss:$0 sm:$0xff] }
  0xc5   :  { %v216_v61 = vmax.f32 %v208_v60, 0.0 }
  0xc7   :  { %491 = vmatmul.msk.f32.gmra.mxu2 %vm226_vm3, %v216_v61 }
  0xc8   :  { %v195_v63 = vpop.f32.mrf.mxu1 }
  0xc9   :  { %v196_v0 = vadd.f32 %v195_v63, %v126_v62 }
  0xcb   :  { %v209_v1 = vadd.f32 %v512_v26, %v196_v0 }
  0xcd   :  { %v217_v2 = vmax.f32 %v209_v1, 0.0 }
  0xcf   :  { %492 = vmatmul.msk.f32.gmra.mxu2 %vm226_vm3, %v217_v2 }
 0x11a   :  { %v268_v5 = vpop.f32.mrf.mxu2 }
 0x11b   :  { %v269_v6 = vadd.f32 %v513_v4, %v268_v5 }
 0x11d   :  { %v292_v7 = vmax.f32 %v269_v6, 0.0 }
 0x11f   :  { %493 = vmatmul.msk.f32.vlgmr.msrb.gmra.mxu3 %vm226_vm3, %v292_v7 }
 0x122   :  { %v271_v8 = vpop.f32.mrf.mxu2 }
 0x123   :  { %v272_v9 = vadd.f32 %v513_v4, %v271_v8 }
 0x125   :  { %v293_v10 = vmax.f32 %v272_v9, 0.0 }
 0x127   :  { %494 = vmatmul.msk.f32.gmra.mxu3 %vm226_vm3, %v293_v10 }
 0x12a   :  { %v274_v11 = vpop.f32.mrf.mxu2 }
 0x12b   :  { %v275_v12 = vadd.f32 %v513_v4, %v274_v11 }
 0x12d   :  { %v294_v13 = vmax.f32 %v275_v12, 0.0 }
 0x12f   :  { %495 = vmatmul.msk.f32.gmra.mxu3 %vm226_vm3, %v294_v13 }
 0x132   :  { %v277_v14 = vpop.f32.mrf.mxu2 }
 0x133   :  { %v278_v15 = vadd.f32 %v513_v4, %v277_v14 }
 0x135   :  { %v295_v16 = vmax.f32 %v278_v15, 0.0 }
 0x137   :  { %496 = vmatmul.msk.f32.gmra.mxu3 %vm226_vm3, %v295_v16 }
 0x13a   :  { %v280_v20 = vpop.f32.mrf.mxu2 }
 0x13b   :  { %v281_v21 = vadd.f32 %v513_v4, %v280_v20 }
 0x13d   :  { %v296_v22 = vmax.f32 %v281_v21, 0.0 }
 0x13f   :  { %497 = vmatmul.msk.f32.gmra.mxu3 %vm226_vm3, %v296_v22 }
 0x142   :  { %v283_v23 = vpop.f32.mrf.mxu2 }
 0x143   :  { %v284_v24 = vadd.f32 %v513_v4, %v283_v23 }
 0x145   :  { %v297_v25 = vmax.f32 %v284_v24, 0.0 }
 0x147   :  { %498 = vmatmul.msk.f32.gmra.mxu3 %vm226_vm3, %v297_v25 }
 0x14a   :  { %v286_v26 = vpop.f32.mrf.mxu2 }
 0x14b   :  { %v287_v27 = vadd.f32 %v513_v4, %v286_v26 }
 0x14d   :  { %v298_v28 = vmax.f32 %v287_v27, 0.0 }
 0x14f   :  { %499 = vmatmul.msk.f32.gmra.mxu3 %vm226_vm3, %v298_v28 }
 0x152   :  { %v289_v29 = vpop.f32.mrf.mxu2 }
 0x153   :  { %v290_v30 = vadd.f32 %v513_v4, %v289_v29 }
 0x155   :  { %v299_v31 = vmax.f32 %v290_v30, 0.0 }
 0x157   :  { %500 = vmatmul.msk.f32.gmra.mxu3 %vm226_vm3, %v299_v31 }
 0x1a2   :  { %v349_v34 = vpop.f32.mrf.mxu3 }
 0x1a3   :  { %v350_v35 = vadd.f32 %v514_v33, %v349_v34 }
 0x1a5   :  { %v373_v36 = vmax.f32 %v350_v35, 0.0 }
 0x1a7   :  { %501 = vmatmul.msk.f32.vlgmr.msrb.gmra.mxu0 %vm226_vm3, %v373_v36 }
 0x1aa   :  { %v352_v37 = vpop.f32.mrf.mxu3 }
 0x1ab   :  { %v353_v38 = vadd.f32 %v514_v33, %v352_v37 }
 0x1ad   :  { %v374_v39 = vmax.f32 %v353_v38, 0.0 }
 0x1af   :  { %502 = vmatmul.msk.f32.gmra.mxu0 %vm226_vm3, %v374_v39 }
 0x1b2   :  { %v355_v40 = vpop.f32.mrf.mxu3 }
 0x1b3   :  { %v356_v41 = vadd.f32 %v514_v33, %v355_v40 }
 0x1b5   :  { %v375_v42 = vmax.f32 %v356_v41, 0.0 }
 0x1b7   :  { %503 = vmatmul.msk.f32.gmra.mxu0 %vm226_vm3, %v375_v42 }
 0x1ba   :  { %v358_v43 = vpop.f32.mrf.mxu3 }
 0x1bb   :  { %v359_v44 = vadd.f32 %v514_v33, %v358_v43 }
 0x1bd   :  { %v376_v45 = vmax.f32 %v359_v44, 0.0 }
 0x1bf   :  { %504 = vmatmul.msk.f32.gmra.mxu0 %vm226_vm3, %v376_v45 }
 0x1c2   :  { %v361_v47 = vpop.f32.mrf.mxu3 }
 0x1c3   :  { %v362_v48 = vadd.f32 %v514_v33, %v361_v47 }
 0x1c5   :  { %v377_v49 = vmax.f32 %v362_v48, 0.0 }
 0x1c7   :  { %505 = vmatmul.msk.f32.gmra.mxu0 %vm226_vm3, %v377_v49 }
 0x1ca   :  { %v364_v50 = vpop.f32.mrf.mxu3 }
 0x1cb   :  { %v365_v51 = vadd.f32 %v514_v33, %v364_v50 }
 0x1cd   :  { %v378_v52 = vmax.f32 %v365_v51, 0.0 }
 0x1cf   :  { %506 = vmatmul.msk.f32.gmra.mxu0 %vm226_vm3, %v378_v52 }
 0x1d2   :  { %v367_v53 = vpop.f32.mrf.mxu3 }
 0x1d3   :  { %v368_v54 = vadd.f32 %v514_v33, %v367_v53 }
 0x1d5   :  { %v379_v55 = vmax.f32 %v368_v54, 0.0 }
 0x1d7   :  { %507 = vmatmul.msk.f32.gmra.mxu0 %vm226_vm3, %v379_v55 }
 0x1da   :  { %v370_v56 = vpop.f32.mrf.mxu3 }
 0x1db   :  { %v371_v57 = vadd.f32 %v514_v33, %v370_v56 }
 0x1dd   :  { %v380_v58 = vmax.f32 %v371_v57, 0.0 }
 0x1df   :  { %508 = vmatmul.msk.f32.gmra.mxu0 %vm226_vm3, %v380_v58 }
 0x224   :  { %v430_v60 = vpop.f32.mrf.mxu0 }
 0x225   :  { %v431_v61 = vadd.f32 %v515_v59, %v430_v60 }
 0x227   :  { %455 = vst.msk [vmem:[%s764_s11] sm:$0xff] %vm454_vm4, %v431_v61 }
 0x22c   :  { %v433_v62 = vpop.f32.mrf.mxu0 }
 0x22d   :  { %v434_v63 = vadd.f32 %v515_v59, %v433_v62 }
 0x22f   :  { %456 = vst.msk [vmem:[%s764_s11 + $0x8] sm:$0xff] %vm454_vm4, %v434_v63 }
 0x234   :  { %v436_v0 = vpop.f32.mrf.mxu0 }
 0x235   :  { %v437_v1 = vadd.f32 %v515_v59, %v436_v0 }
 0x237   :  { %457 = vst.msk [vmem:[%s764_s11 + $0x10] sm:$0xff] %vm454_vm4, %v437_v1 }
 0x23c   :  { %v439_v2 = vpop.f32.mrf.mxu0 }
 0x23d   :  { %v440_v3 = vadd.f32 %v515_v59, %v439_v2 }
 0x23f   :  { %458 = vst.msk [vmem:[%s764_s11 + $0x18] sm:$0xff] %vm454_vm4, %v440_v3 }
 0x244   :  { %v442_v4 = vpop.f32.mrf.mxu0 }
 0x245   :  { %v443_v5 = vadd.f32 %v515_v59, %v442_v4 }
 0x247   :  { %459 = vst.msk [vmem:[%s764_s11 + $0x20] sm:$0xff] %vm454_vm4, %v443_v5 }
 0x24c   :  { %v445_v6 = vpop.f32.mrf.mxu0 }
 0x24d   :  { %v446_v7 = vadd.f32 %v515_v59, %v445_v6 }
 0x24f   :  { %460 = vst.msk [vmem:[%s764_s11 + $0x28] sm:$0xff] %vm454_vm4, %v446_v7 }
 0x254   :  { %v448_v8 = vpop.f32.mrf.mxu0 }
 0x255   :  { %v449_v9 = vadd.f32 %v515_v59, %v448_v8 }
 0x257   :  { %461 = vst.msk [vmem:[%s764_s11 + $0x30] sm:$0xff] %vm454_vm4, %v449_v9 }
 0x25c   :  { %v451_v10 = vpop.f32.mrf.mxu0 }
 0x25d   :  { %v452_v11 = vadd.f32 %v515_v59, %v451_v10 }
 0x25f   :  { %462 = vst.msk [vmem:[%s764_s11 + $0x38] sm:$0xff] %vm454_vm4, %v452_v11 }

</bundles_post_ra>
